<compile_context>
chip_gen: v6e
topology: v6e:2x2x1
jax: 0.10.0
libtpu: 0.0.40
codegen_flags: <defaults>
</compile_context>

<pallas_src>
import jax
import jax.numpy as jnp
from jax.experimental import pallas as pl
from jax.experimental.pallas import tpu as pltpu

MIXTURE_DIM = 50


def _flow_loss_kernel(x_ref, p_ref, s_ref, out_ref):
    # x_ref : (2, N)  VMEM   row 0 = x1, row 1 = x2, samples on lanes
    # p_ref : (2*M_pad, 3) VMEM
    #         col 0 = weight, col 1 = bias, col 2 = softmax(mixture_weights)
    #         rows [0:M_pad] = mixture1, rows [M_pad:] = mixture2 (pad rows all zero)
    # s_ref : (3,)   SMEM    [inner_w00, inner_w01, inner_b]
    # out_ref: (1, 1) SMEM   scalar loss
    m_pad = p_ref.shape[0] // 2
    n = x_ref.shape[1]

    x1 = x_ref[0:1, :]                                   # (1, N)
    x2 = x_ref[1:2, :]                                   # (1, N)

    # ---- inner_net (scalars straight from SMEM, no cross-lane extraction) ----
    iw0 = s_ref[0]
    iw1 = s_ref[1]
    ib = s_ref[2]
    x_inner = x1 * iw0 + x2 * iw1 + ib                   # (1, N)

    def mixture_pass(row0, x_in):
        # One 56-row pass: params broadcast along lanes, reduce over sublanes right away
        # so only ~7 vregs per intermediate are ever live (no 112-row fused tile).
        w = p_ref[row0:row0 + m_pad, 0:1]                # (M_pad, 1)
        b = p_ref[row0:row0 + m_pad, 1:2]                # (M_pad, 1)
        wsm = p_ref[row0:row0 + m_pad, 2:3]              # (M_pad, 1) softmax weights
        wsq = w * w                                      # NonNegativeLinear: weight ** 2
        pre = wsq * x_in + b                             # (M_pad, N)
        # sigmoid via a single EUP transcendental (exact, not approx):
        s = 0.5 * (jnp.tanh(0.5 * pre) + 1.0)            # (M_pad, N)
        sw = s * wsm                                     # softmax-weighted sigmoid
        z = jnp.sum(sw, axis=0, keepdims=True)           # (1, N)
        dw = (sw - sw * s) * wsq                         # wsm * s * (1 - s) * w**2
        m = jnp.sum(dw, axis=0, keepdims=True)           # (1, N)
        return z, m

    z1, m1 = mixture_pass(0, x1)
    z2, m2 = mixture_pass(m_pad, x_inner)
    m2 = m2 * jnp.abs(iw1)                               # |inner_net.weight[0,1]|

    # ---- fused scalar tail: one mask, one log pass, one reduction ----
    z = jnp.concatenate([z1, z2], axis=0)                # (2, N) — tiny, 2 sublanes
    m = jnp.concatenate([m1, m2], axis=0)                # (2, N)
    eps = jnp.float32(1e-8)
    m = jnp.where((z >= 0.0) & (z <= 1.0), m, eps)
    # NOTE: log(m) can still hit -inf if a derivative underflows to 0; this matches the
    # PyTorch reference semantics exactly, so it is intentionally not clamped.
    total = jnp.sum(jnp.log(m))
    out_ref[0, 0] = -total / jnp.float32(2 * n)


def pack_params(params):
    """Pack module parameters ONCE into the kernel's buffers.

    params = (w1 (M,1), b1 (M,), mw1 (M,), w2 (M,1), b2 (M,), mw2 (M,),
              inner_w (1,2), inner_b (1,))
    Returns (packed (2*M_pad, 3) f32, scal (3,) f32).
    """
    w1, b1, mw1, w2, b2, mw2, iw, ib = params
    M = w1.shape[0]
    m_pad = ((M + 7) // 8) * 8                           # sublane-aligned group size

    def pad_col(v):
        out = jnp.zeros((m_pad,), jnp.float32)
        return out.at[:M].set(v.reshape(-1).astype(jnp.float32))

    # Softmax hoisted out of the kernel: parameter-only math, computed once here.
    sm1 = jax.nn.softmax(mw1.reshape(-1).astype(jnp.float32))
    sm2 = jax.nn.softmax(mw2.reshape(-1).astype(jnp.float32))

    col_w = jnp.concatenate([pad_col(w1), pad_col(w2)])
    col_b = jnp.concatenate([pad_col(b1), pad_col(b2)])
    col_mw = jnp.concatenate([pad_col(sm1), pad_col(sm2)])  # pad rows = 0 -> zero weight
    packed = jnp.stack([col_w, col_b, col_mw], axis=1)   # (2*m_pad, 3)

    scal = jnp.concatenate(
        [iw.reshape(-1).astype(jnp.float32), ib.reshape(-1).astype(jnp.float32)])  # (3,)
    return packed, scal


def pack_inputs(inp):
    """Transpose samples onto lanes ONCE: (N, 2) -> (2, N) f32."""
    return inp.astype(jnp.float32).T


def autoregressive_flow_2d_loss(x2d, packed, scal):
    """Pre-packed interface: x2d (2, N), packed (2*M_pad, 3), scal (3,)."""
    out = pl.pallas_call(
        _flow_loss_kernel,
        out_shape=jax.ShapeDtypeStruct((1, 1), jnp.float32),
        in_specs=[
            pl.BlockSpec(memory_space=pltpu.MemorySpace.VMEM),   # x (2, N)
            pl.BlockSpec(memory_space=pltpu.MemorySpace.VMEM),   # packed params
            pl.BlockSpec(memory_space=pltpu.MemorySpace.SMEM),   # inner_net scalars
        ],
        out_specs=pl.BlockSpec(memory_space=pltpu.MemorySpace.SMEM),
    )(x2d, packed, scal)
    return out[0, 0]


def reference_loss(inp, w1, b1, mw1, w2, b2, mw2, iw, ib):
    """Pure-JAX transcription of the PyTorch forward for validation."""
    x = inp.astype(jnp.float32)
    x1 = x[:, 0:1]
    s1 = jax.nn.sigmoid(x1 @ (w1 ** 2).T + b1)
    wsm1 = jax.nn.softmax(mw1)
    z1 = s1 @ wsm1
    m1 = ((s1 - s1 ** 2) * (jnp.abs(w1.T) ** 2)) @ wsm1
    x_inner = x @ iw.T + ib
    s2 = jax.nn.sigmoid(x_inner @ (w2 ** 2).T + b2)
    wsm2 = jax.nn.softmax(mw2)
    z2 = s2 @ wsm2
    m2 = ((s2 - s2 ** 2) * (jnp.abs(w2.T) ** 2) * jnp.abs(iw[0, 1])) @ wsm2
    m1 = jnp.where((z1 >= 0) & (z1 <= 1), m1, 1e-8)
    m2 = jnp.where((z2 >= 0) & (z2 <= 1), m2, 1e-8)
    probs = jnp.stack([m1, m2], axis=1)
    return -jnp.mean(jnp.log(probs))


if __name__ == "__main__":
    key = jax.random.PRNGKey(0)
    kx, k1, k2, k3, k4, k5, k6 = jax.random.split(key, 7)

    N, M = 128, MIXTURE_DIM
    inp = jax.random.normal(kx, (N, 2), dtype=jnp.float32)

    # Deterministic synthetic parameters (shapes from the module's __init__);
    # uniform bounds mimic PyTorch's default Linear init (1/sqrt(fan_in)).
    w1 = jax.random.uniform(k1, (M, 1), minval=-1.0, maxval=1.0, dtype=jnp.float32)
    b1 = jax.random.uniform(k2, (M,), minval=-1.0, maxval=1.0, dtype=jnp.float32)
    mw1 = jnp.ones((M,), jnp.float32)
    w2 = jax.random.uniform(k3, (M, 1), minval=-1.0, maxval=1.0, dtype=jnp.float32)
    b2 = jax.random.uniform(k4, (M,), minval=-1.0, maxval=1.0, dtype=jnp.float32)
    mw2 = jnp.ones((M,), jnp.float32)
    bnd = 1.0 / (2.0 ** 0.5)
    iw = jax.random.uniform(k5, (1, 2), minval=-bnd, maxval=bnd, dtype=jnp.float32)
    ib = jax.random.uniform(k6, (1,), minval=-bnd, maxval=bnd, dtype=jnp.float32)

    params = (w1, b1, mw1, w2, b2, mw2, iw, ib)

    # Pack once (module-state style), then the loss call is just the kernel.
    packed, scal = pack_params(params)
    x2d = pack_inputs(inp)
    packed, scal, x2d = jax.block_until_ready((packed, scal, x2d))

    loss = autoregressive_flow_2d_loss(x2d, packed, scal)
    loss = jax.block_until_ready(loss)

    ref = reference_loss(inp, *params)
    assert jnp.allclose(loss, ref, rtol=1e-5, atol=1e-5), (float(loss), float(ref))

    print("KERNEL_OK")
</pallas_src>

<mosaic_0001>
module attributes {stable_mosaic.version = 11 : i64} {
  func.func @_flow_loss_kernel(%arg0: memref<2x128xf32, #tpu.memory_space<vmem>>, %arg1: memref<112x3xf32, #tpu.memory_space<vmem>>, %arg2: memref<3xf32, #tpu.memory_space<smem>>, %arg3: memref<1x1xf32, #tpu.memory_space<smem>>) attributes {dimension_semantics = [], scalar_prefetch = 0 : i64, scratch_operands = 0 : i64, tpu.core_type = #tpu.core_type<tc>} {
    %c0 = arith.constant 0 : index
    %c0_0 = arith.constant 0 : index
    %0 = vector.load %arg0[%c0, %c0_0] : memref<2x128xf32, #tpu.memory_space<vmem>>, vector<1x128xf32>
    %c1 = arith.constant 1 : index
    %c0_1 = arith.constant 0 : index
    %1 = vector.load %arg0[%c1, %c0_1] : memref<2x128xf32, #tpu.memory_space<vmem>>, vector<1x128xf32>
    %c0_2 = arith.constant 0 : index
    %2 = memref.load %arg2[%c0_2] : memref<3xf32, #tpu.memory_space<smem>>
    %c1_3 = arith.constant 1 : index
    %3 = memref.load %arg2[%c1_3] : memref<3xf32, #tpu.memory_space<smem>>
    %c2 = arith.constant 2 : index
    %4 = memref.load %arg2[%c2] : memref<3xf32, #tpu.memory_space<smem>>
    %5 = vector.broadcast %2 : f32 to vector<1x128xf32>
    %6 = arith.mulf %0, %5 : vector<1x128xf32>
    %7 = vector.broadcast %3 : f32 to vector<1x128xf32>
    %8 = arith.mulf %1, %7 : vector<1x128xf32>
    %9 = arith.addf %6, %8 : vector<1x128xf32>
    %10 = vector.broadcast %4 : f32 to vector<1x128xf32>
    %11 = arith.addf %9, %10 : vector<1x128xf32>
    %c0_4 = arith.constant 0 : index
    %c0_5 = arith.constant 0 : index
    %12 = vector.load %arg1[%c0_4, %c0_5] : memref<112x3xf32, #tpu.memory_space<vmem>>, vector<56x1xf32>
    %c0_6 = arith.constant 0 : index
    %c1_7 = arith.constant 1 : index
    %13 = vector.load %arg1[%c0_6, %c1_7] : memref<112x3xf32, #tpu.memory_space<vmem>>, vector<56x1xf32>
    %c0_8 = arith.constant 0 : index
    %c2_9 = arith.constant 2 : index
    %14 = vector.load %arg1[%c0_8, %c2_9] : memref<112x3xf32, #tpu.memory_space<vmem>>, vector<56x1xf32>
    %15 = arith.mulf %12, %12 : vector<56x1xf32>
    %16 = vector.broadcast %15 : vector<56x1xf32> to vector<56x128xf32>
    %17 = vector.broadcast %0 : vector<1x128xf32> to vector<56x128xf32>
    %18 = arith.mulf %16, %17 : vector<56x128xf32>
    %19 = vector.broadcast %13 : vector<56x1xf32> to vector<56x128xf32>
    %20 = arith.addf %18, %19 : vector<56x128xf32>
    %cst = arith.constant 5.000000e-01 : f32
    %21 = vector.broadcast %cst : f32 to vector<56x128xf32>
    %22 = arith.mulf %21, %20 : vector<56x128xf32>
    %23 = math.tanh %22 : vector<56x128xf32>
    %cst_10 = arith.constant 1.000000e+00 : f32
    %24 = vector.broadcast %cst_10 : f32 to vector<56x128xf32>
    %25 = arith.addf %23, %24 : vector<56x128xf32>
    %cst_11 = arith.constant 5.000000e-01 : f32
    %26 = vector.broadcast %cst_11 : f32 to vector<56x128xf32>
    %27 = arith.mulf %26, %25 : vector<56x128xf32>
    %28 = vector.broadcast %14 : vector<56x1xf32> to vector<56x128xf32>
    %29 = arith.mulf %27, %28 : vector<56x128xf32>
    %cst_12 = arith.constant dense<0.000000e+00> : vector<128xf32>
    %30 = vector.multi_reduction <add>, %29, %cst_12 [0] : vector<56x128xf32> to vector<128xf32>
    %31 = vector.shape_cast %30 : vector<128xf32> to vector<1x128xf32>
    %32 = arith.mulf %29, %27 : vector<56x128xf32>
    %33 = arith.subf %29, %32 : vector<56x128xf32>
    %34 = vector.broadcast %15 : vector<56x1xf32> to vector<56x128xf32>
    %35 = arith.mulf %33, %34 : vector<56x128xf32>
    %cst_13 = arith.constant dense<0.000000e+00> : vector<128xf32>
    %36 = vector.multi_reduction <add>, %35, %cst_13 [0] : vector<56x128xf32> to vector<128xf32>
    %37 = vector.shape_cast %36 : vector<128xf32> to vector<1x128xf32>
    %c56 = arith.constant 56 : index
    %c0_14 = arith.constant 0 : index
    %38 = vector.load %arg1[%c56, %c0_14] : memref<112x3xf32, #tpu.memory_space<vmem>>, vector<56x1xf32>
    %c56_15 = arith.constant 56 : index
    %c1_16 = arith.constant 1 : index
    %39 = vector.load %arg1[%c56_15, %c1_16] : memref<112x3xf32, #tpu.memory_space<vmem>>, vector<56x1xf32>
    %c56_17 = arith.constant 56 : index
    %c2_18 = arith.constant 2 : index
    %40 = vector.load %arg1[%c56_17, %c2_18] : memref<112x3xf32, #tpu.memory_space<vmem>>, vector<56x1xf32>
    %41 = arith.mulf %38, %38 : vector<56x1xf32>
    %42 = vector.broadcast %41 : vector<56x1xf32> to vector<56x128xf32>
    %43 = vector.broadcast %11 : vector<1x128xf32> to vector<56x128xf32>
    %44 = arith.mulf %42, %43 : vector<56x128xf32>
    %45 = vector.broadcast %39 : vector<56x1xf32> to vector<56x128xf32>
    %46 = arith.addf %44, %45 : vector<56x128xf32>
    %cst_19 = arith.constant 5.000000e-01 : f32
    %47 = vector.broadcast %cst_19 : f32 to vector<56x128xf32>
    %48 = arith.mulf %47, %46 : vector<56x128xf32>
    %49 = math.tanh %48 : vector<56x128xf32>
    %cst_20 = arith.constant 1.000000e+00 : f32
    %50 = vector.broadcast %cst_20 : f32 to vector<56x128xf32>
    %51 = arith.addf %49, %50 : vector<56x128xf32>
    %cst_21 = arith.constant 5.000000e-01 : f32
    %52 = vector.broadcast %cst_21 : f32 to vector<56x128xf32>
    %53 = arith.mulf %52, %51 : vector<56x128xf32>
    %54 = vector.broadcast %40 : vector<56x1xf32> to vector<56x128xf32>
    %55 = arith.mulf %53, %54 : vector<56x128xf32>
    %cst_22 = arith.constant dense<0.000000e+00> : vector<128xf32>
    %56 = vector.multi_reduction <add>, %55, %cst_22 [0] : vector<56x128xf32> to vector<128xf32>
    %57 = vector.shape_cast %56 : vector<128xf32> to vector<1x128xf32>
    %58 = arith.mulf %55, %53 : vector<56x128xf32>
    %59 = arith.subf %55, %58 : vector<56x128xf32>
    %60 = vector.broadcast %41 : vector<56x1xf32> to vector<56x128xf32>
    %61 = arith.mulf %59, %60 : vector<56x128xf32>
    %cst_23 = arith.constant dense<0.000000e+00> : vector<128xf32>
    %62 = vector.multi_reduction <add>, %61, %cst_23 [0] : vector<56x128xf32> to vector<128xf32>
    %63 = vector.shape_cast %62 : vector<128xf32> to vector<1x128xf32>
    %64 = math.absf %3 : f32
    %65 = vector.broadcast %64 : f32 to vector<1x128xf32>
    %66 = arith.mulf %63, %65 : vector<1x128xf32>
    %67 = tpu.concatenate %31, %57 in 0 : vector<1x128xf32>, vector<1x128xf32> -> vector<2x128xf32>
    %68 = tpu.concatenate %37, %66 in 0 : vector<1x128xf32>, vector<1x128xf32> -> vector<2x128xf32>
    %cst_24 = arith.constant 0.000000e+00 : f32
    %69 = vector.broadcast %cst_24 : f32 to vector<2x128xf32>
    %70 = arith.cmpf oge, %67, %69 : vector<2x128xf32>
    %cst_25 = arith.constant 1.000000e+00 : f32
    %71 = vector.broadcast %cst_25 : f32 to vector<2x128xf32>
    %72 = arith.cmpf ole, %67, %71 : vector<2x128xf32>
    %73 = arith.andi %70, %72 : vector<2x128xi1>
    %cst_26 = arith.constant 9.99999993E-9 : f32
    %74 = vector.broadcast %cst_26 : f32 to vector<2x128xf32>
    %75 = arith.select %73, %68, %74 : vector<2x128xi1>, vector<2x128xf32>
    %76 = math.log %75 : vector<2x128xf32>
    %77 = vector.shape_cast %76 : vector<2x128xf32> to vector<1x2x128xf32>
    %cst_27 = arith.constant dense<0.000000e+00> : vector<1xf32>
    %78 = vector.multi_reduction <add>, %77, %cst_27 [1, 2] : vector<1x2x128xf32> to vector<1xf32>
    %79 = vector.shape_cast %78 : vector<1xf32> to vector<1x1x1xf32>
    %80 = vector.extract %79[0, 0, 0] : f32 from vector<1x1x1xf32>
    %cst_28 = arith.constant 0.000000e+00 : f32
    %81 = arith.subf %cst_28, %80 : f32
    %cst_29 = arith.constant 2.560000e+02 : f32
    %82 = arith.divf %81, %cst_29 : f32
    %c0_30 = arith.constant 0 : index
    %c0_31 = arith.constant 0 : index
    %83 = memref.load %arg3[%c0_30, %c0_31] : memref<1x1xf32, #tpu.memory_space<smem>>
    memref.store %82, %arg3[%c0_30, %c0_31] : memref<1x1xf32, #tpu.memory_space<smem>>
    return
  }
}

</mosaic_0001>

<bundles_post_ra>
// kernel: tpu_custom_call.1
= control target key start
LH: loop header
LB: loop body
LE: loop exit
PB: predicated region body
PF: predicated region fallthrough
CT: control target
= control target key end

     0   :  { %8 = vsyncpa [#allocation4], 0  ;;  %s748_s0 = inlined_call_operand.vmem [shape: f32[2,128], index: 0, kind: input, shape index: {}]   ;;  %s749_s1 = inlined_call_operand.vmem [shape: f32[112,3], index: 1, kind: input, shape index: {}]   ;;  %s750_s2 = inlined_call_operand.vmem [shape: f32[3], index: 2, kind: input, shape index: {}]   ;;  %s751_s3 = inlined_call_operand.hbm [shape: f32[1,1], index: 3, kind: output, shape index: {}]  }
   0x1   :  { %9 = vsyncpa [#allocation3], 0  ;;  %s20_s14 = sshll.u32 %s750_s2, 4  ;;  %s21_s14 = int_to_ptr.vmem [resolvable:$true] %s20_s14 }
   0x2   :  { %s552_s15 = scalar_lea.vmem %s21_s14, 16  ;;  %p557_p1 = scmp.lt.s32.totalorder %s21_s14, %s21_s14 }
   0x3   :  { %p553_p0 = scmp.ne.s32.totalorder %s21_s14, %s552_s15  ;;  %p558_p2 = scmp.lt.s32.totalorder %s552_s15, %s552_s15 }
   0x5   :  { %p559_p3 = por %p558_p2, %p557_p1 }
   0x7   :  { %p560_p4 = pnand %p559_p3, %p553_p0 }
   0x9   :  { %563 = shalt.err (!%p560_p4)
}
   0xa   :  { %s576_s16 = smov [#allocation2]  }
   0xb   :  { %23 = dma.vmem_to_smem %s21_s14, 16, %s576_s16, [#allocation4]  }
   0xc   :  { %572 = dma.done.wait [#allocation4], 16  }
   0xd   :  { %573 = vsyncadd [#allocation4], 4294967280 }
   0xe   :  { %27 = sfence }
   0xf   :  { %v607_v0 = vld [vmem:[%s749_s1 + $0x38] sm:$0xff]  ;;  %v612_v1 = vld [vmem:[%s749_s1] sm:$0xff]  ;;  %v577_v3 = vmov 0   ;;  %v626_v6 = vld [vmem:[%s749_s1 + $0x8] sm:$0xff]  ;;  %v578_v12 = vmov 1   ;;  %v579_v30 = vmov 2   ;;  %v89_v43 = vlaneseq }
  0x10   :  { %v617_v2 = vld [vmem:[%s749_s1 + $0x40] sm:$0xff]  ;;  %513 = vset.pattern.permute.xlu1 %v577_v3  ;;  %512 = vset.pattern.permute.xlu0 %v577_v3  ;;  %v257_v4 = vmul.f32 %v607_v0, %v607_v0  ;;  %v47_v5 = vmul.f32 %v612_v1, %v612_v1  ;;  %v48_v8 = vmul.f32 %v626_v6, %v626_v6  ;;  %v252_v9 = vld [vmem:[%s749_s1 + $0x48] sm:$0xff]  ;;  %v42_v11 = vld [vmem:[%s749_s1 + $0x10] sm:$0xff]  ;;  %s674_s17 = sld [smem:[#allocation2 + $0x1]]  ;;  %vm463_vm0 = vcmask 1040384   ;;  %s580_s25 = smov [#allocation5]  }
  0x11   :  { %v258_v7 = vmul.f32 %v617_v2, %v617_v2  ;;  %v259_v10 = vmul.f32 %v252_v9, %v252_v9  ;;  %v49_v13 = vmul.f32 %v42_v11, %v42_v11  ;;  %v253_v14 = vld [vmem:[%s749_s1 + $0x50] sm:$0xff]  ;;  %v43_v16 = vld [vmem:[%s749_s1 + $0x18] sm:$0xff]  ;;  %v44_v20 = vld [vmem:[%s749_s1 + $0x20] sm:$0xff]  ;;  %s504_s21 = sld [smem:[#allocation2 + $0x2]]  ;;  %v90_v48 = vshrl.u32 %v89_v43, 7 }
  0x12   :  { %266 = vperm.xlu0 %512, %v257_v4   ;;  %56 = vperm.xlu1 %513, %v47_v5   ;;  %v260_v15 = vmul.f32 %v253_v14, %v253_v14  ;;  %v50_v17 = vmul.f32 %v43_v16, %v43_v16  ;;  %v254_v18 = vld [vmem:[%s749_s1 + $0x58] sm:$0xff]  ;;  %v51_v21 = vmul.f32 %v44_v20, %v44_v20  ;;  %v255_v22 = vld [vmem:[%s749_s1 + $0x60] sm:$0xff]  ;;  %v45_v24 = vld [vmem:[%s749_s1 + $0x28] sm:$0xff]  ;;  %vm472_vm4 = vcmask 1041408  }
  0x13   :  { %v261_v19 = vmul.f32 %v254_v18, %v254_v18  ;;  %v262_v23 = vmul.f32 %v255_v22, %v255_v22  ;;  %v52_v25 = vmul.f32 %v45_v24, %v45_v24  ;;  %v256_v26 = vld [vmem:[%s749_s1 + $0x68] sm:$0xff]  ;;  %v46_v28 = vld [vmem:[%s749_s1 + $0x30] sm:$0xff]  ;;  %s30_s1 = sld [smem:[#allocation2]]  ;;  %v28_v35 = vld [vmem:[%s748_s0] sm:$0x1]  ;;  %v91_v52 = vsub.s32 0, %v90_v48 }
  0x14   :  { %v263_v27 = vmul.f32 %v256_v26, %v256_v26  ;;  %v53_v29 = vmul.f32 %v46_v28, %v46_v28  ;;  %v29_v36 = vld [vmem:[%s748_s0 + $0x1] sm:$0x1] }
  0x15   :  { %v92_v5 = vrot.slane %v28_v35, %v91_v52 }
  0x16   :  { %271 = vperm.xlu0 %512, %v258_v7   ;;  %61 = vperm.xlu1 %513, %v48_v8   ;;  %v35_v38 = vstv %s674_s17  ;;  %s460_s0 = sand.u32 2147483647, %s674_s17 }
  0x17   :  { %v36_v42 = vmul.f32 %v35_v38, %v29_v36  ;;  %v38_v47 = vstv %s504_s21 }
  0x19   :  { %v33_v37 = vstv %s30_s1 }
  0x1a   :  { %276 = vperm.xlu0 %512, %v259_v10   ;;  %514 = vset.pattern.permute.xlu1 %v578_v12  ;;  %v34_v41 = vmul.f32 %v33_v37, %v28_v35 }
  0x1b   :  { %312 = vperm.xlu1 %514, %v607_v0  }
  0x1c   :  { %v37_v46 = vadd.f32 %v36_v42, %v34_v41 }
  0x1e   :  { %515 = vset.pattern.permute.xlu0 %v578_v12  ;;  %v39_v50 = vadd.f32 %v38_v47, %v37_v46 }
  0x1f   :  { %317 = vperm.xlu0 %515, %v617_v2   ;;  %516 = vset.pattern.permute.xlu1 %v577_v3 }
  0x20   :  { %66 = vperm.xlu1 %516, %v49_v13   ;;  %v691_v54 = vrot.slane %v39_v50, %v91_v52 }
  0x23   :  { %107 = vperm.xlu0 %515, %v626_v6  }
  0x24   :  { %517 = vset.pattern.permute.xlu1 %v578_v12 }
  0x25   :  { %102 = vperm.xlu1 %517, %v612_v1  }
  0x27   :  { %322 = vperm.xlu0 %515, %v252_v9  }
  0x29   :  { %518 = vset.pattern.permute.xlu1 %v577_v3 }
  0x2a   :  { %281 = vperm.xlu1 %518, %v260_v15  }
  0x2b   :  { %112 = vperm.xlu0 %515, %v42_v11  }
  0x2e   :  { %71 = vperm.xlu1 %518, %v50_v17  }
  0x2f   :  { %327 = vperm.xlu0 %515, %v253_v14  }
  0x32   :  { %286 = vperm.xlu1 %518, %v261_v19  }
  0x33   :  { %117 = vperm.xlu0 %515, %v43_v16  }
  0x36   :  { %76 = vperm.xlu1 %518, %v51_v21  }
  0x37   :  { %332 = vperm.xlu0 %515, %v254_v18  }
  0x3a   :  { %291 = vperm.xlu1 %518, %v262_v23  }
  0x3b   :  { %122 = vperm.xlu0 %515, %v44_v20  }
  0x3e   :  { %81 = vperm.xlu1 %518, %v52_v25  }
  0x3f   :  { %337 = vperm.xlu0 %515, %v255_v22  }
  0x42   :  { %296 = vperm.xlu1 %518, %v263_v27  }
  0x43   :  { %127 = vperm.xlu0 %515, %v45_v24  }
  0x46   :  { %86 = vperm.xlu1 %518, %v53_v29  }
  0x47   :  { %132 = vperm.xlu0 %515, %v46_v28  }
  0x4a   :  { %519 = vset.pattern.permute.xlu1 %v578_v12 }
  0x4b   :  { %521 = vset.pattern.permute.xlu0 %v579_v30  ;;  %342 = vperm.xlu1 %519, %v256_v26  }
  0x4c   :  { %385 = vperm.xlu0 %521, %v617_v2  }
  0x4f   :  { %520 = vset.pattern.permute.xlu1 %v579_v30 }
  0x50   :  { %389 = vperm.xlu0 %521, %v252_v9   ;;  %381 = vperm.xlu1 %520, %v607_v0  }
  0x54   :  { %393 = vperm.xlu0 %521, %v253_v14   ;;  %171 = vperm.xlu1 %520, %v612_v1  }
  0x58   :  { %397 = vperm.xlu0 %521, %v254_v18   ;;  %175 = vperm.xlu1 %520, %v626_v6  }
  0x5c   :  { %401 = vperm.xlu0 %521, %v255_v22   ;;  %179 = vperm.xlu1 %520, %v42_v11  }
  0x60   :  { %405 = vperm.xlu0 %521, %v256_v26   ;;  %183 = vperm.xlu1 %520, %v43_v16  }
  0x64   :  { %187 = vperm.xlu1 %520, %v44_v20  }
  0x68   :  { %191 = vperm.xlu1 %520, %v45_v24  }
  0x6c   :  { %195 = vperm.xlu1 %520, %v46_v28  }
  0x8d   :  { %v670_v31 = vpop.permute.xlu1 %56  ;;  %v672_v32 = vpop.permute.xlu0 %266 }
  0x8e   :  { %v303_v58 = vmul.f32 %v691_v54, %v672_v32  ;;  %v93_v13 = vmul.f32 %v92_v5, %v670_v31 }
  0x91   :  { %v676_v33 = vpop.permute.xlu1 %61  ;;  %v678_v34 = vpop.permute.xlu0 %271 }
  0x92   :  { %v304_v56 = vmul.f32 %v691_v54, %v678_v34  ;;  %v94_v12 = vmul.f32 %v92_v5, %v676_v33 }
  0x95   :  { %v687_v39 = vpop.permute.xlu0 %276 }
  0x96   :  { %v313_v40 = vpop.permute.xlu1 %312  ;;  %v305_v62 = vmul.f32 %v691_v54, %v687_v39 }
  0x97   :  { %v345_v63 = vadd.f32 %v313_v40, %v303_v58 }
  0x99   :  { %v352_v6 = vmul.f32 0.5, %v345_v63 }
  0x9a   :  { %v318_v44 = vpop.permute.xlu0 %317 }
  0x9b   :  { %v689_v45 = vpop.permute.xlu1 %66  ;;  %v346_v60 = vadd.f32 %v318_v44, %v304_v56 }
  0x9c   :  { %v95_v17 = vmul.f32 %v92_v5, %v689_v45 }
  0x9d   :  { %v353_v1 = vmul.f32 0.5, %v346_v60 }
  0x9e   :  { %v108_v49 = vpop.permute.xlu0 %107 }
  0x9f   :  { %522 = vtanh.f32 %v353_v1  ;;  %v136_v18 = vadd.f32 %v108_v49, %v94_v12 }
  0xa0   :  { %v103_v51 = vpop.permute.xlu1 %102  ;;  %524 = vtanh.f32 %v352_v6 }
  0xa1   :  { %v135_v20 = vadd.f32 %v103_v51, %v93_v13  ;;  %v143_v25 = vmul.f32 0.5, %v136_v18 }
  0xa2   :  { %v323_v53 = vpop.permute.xlu0 %322 }
  0xa3   :  { %v347_v2 = vadd.f32 %v323_v53, %v305_v62  ;;  %v142_v28 = vmul.f32 0.5, %v135_v20 }
  0xa5   :  { %v693_v55 = vpop.permute.xlu1 %281  ;;  %v354_v9 = vmul.f32 0.5, %v347_v2 }
  0xa6   :  { %v113_v57 = vpop.permute.xlu0 %112  ;;  %v306_v4 = vmul.f32 %v691_v54, %v693_v55 }
  0xa7   :  { %526 = vtanh.f32 %v354_v9  ;;  %v137_v21 = vadd.f32 %v113_v57, %v95_v17 }
  0xa9   :  { %v699_v59 = vpop.permute.xlu1 %71  ;;  %v144_v30 = vmul.f32 0.5, %v137_v21 }
  0xaa   :  { %v328_v61 = vpop.permute.xlu0 %327  ;;  %v96_v26 = vmul.f32 %v92_v5, %v699_v59 }
  0xab   :  { %v348_v7 = vadd.f32 %v328_v61, %v306_v4 }
  0xac   :  { %v523_v40 = vpop.eup %522 }
  0xad   :  { %v703_v0 = vpop.permute.xlu1 %286  ;;  %v355_v14 = vmul.f32 0.5, %v348_v7  ;;  %v525_v44 = vpop.eup %524  ;;  %v367_v49 = vadd.f32 1.0, %v523_v40 }
  0xae   :  { %v118_v3 = vpop.permute.xlu0 %117  ;;  %v307_v11 = vmul.f32 %v691_v54, %v703_v0  ;;  %v366_v53 = vadd.f32 1.0, %v525_v44 }
  0xaf   :  { %528 = vtanh.f32 %v355_v14  ;;  %v138_v35 = vadd.f32 %v118_v3, %v96_v26  ;;  %v374_v61 = vmul.f32 0.5, %v367_v49 }
  0xb0   :  { %v373_v6 = vmul.f32 0.5, %v366_v53 }
  0xb1   :  { %v707_v8 = vpop.permute.xlu1 %76  ;;  %v145_v41 = vmul.f32 0.5, %v138_v35 }
  0xb2   :  { %v333_v10 = vpop.permute.xlu0 %332  ;;  %v97_v42 = vmul.f32 %v92_v5, %v707_v8 }
  0xb3   :  { %v349_v15 = vadd.f32 %v333_v10, %v307_v11 }
  0xb4   :  { %v527_v50 = vpop.eup %526 }
  0xb5   :  { %v713_v16 = vpop.permute.xlu1 %291  ;;  %v356_v22 = vmul.f32 0.5, %v349_v15  ;;  %v368_v62 = vadd.f32 1.0, %v527_v50 }
  0xb6   :  { %v123_v19 = vpop.permute.xlu0 %122  ;;  %v308_v23 = vmul.f32 %v691_v54, %v713_v16 }
  0xb7   :  { %530 = vtanh.f32 %v356_v22  ;;  %v139_v46 = vadd.f32 %v123_v19, %v97_v42 }
  0xb8   :  { %532 = vtanh.f32 %v143_v25 }
  0xb9   :  { %v718_v24 = vpop.permute.xlu1 %81  ;;  %534 = vtanh.f32 %v142_v28  ;;  %v146_v57 = vmul.f32 0.5, %v139_v46 }
  0xba   :  { %v338_v27 = vpop.permute.xlu0 %337  ;;  %536 = vtanh.f32 %v144_v30  ;;  %v98_v47 = vmul.f32 %v92_v5, %v718_v24 }
  0xbb   :  { %v350_v29 = vadd.f32 %v338_v27, %v308_v23 }
  0xbc   :  { %v529_v56 = vpop.eup %528 }
  0xbd   :  { %v357_v36 = vmul.f32 0.5, %v350_v29  ;;  %v721_v37 = vpop.permute.xlu1 %296  ;;  %v369_v7 = vadd.f32 1.0, %v529_v56 }
  0xbe   :  { %v128_v38 = vpop.permute.xlu0 %127  ;;  %v309_v52 = vmul.f32 %v691_v54, %v721_v37  ;;  %v375_v54 = vmul.f32 0.5, %v368_v62 }
  0xbf   :  { %538 = vtanh.f32 %v357_v36  ;;  %v140_v51 = vadd.f32 %v128_v38, %v98_v47  ;;  %v376_v19 = vmul.f32 0.5, %v369_v7 }
  0xc0   :  { %540 = vtanh.f32 %v145_v41 }
  0xc1   :  { %v724_v43 = vpop.permute.xlu1 %86  ;;  %v147_v2 = vmul.f32 0.5, %v140_v51  ;;  %542 = vtanh.f32 %v146_v57 }
  0xc2   :  { %v133_v48 = vpop.permute.xlu0 %132  ;;  %v99_v58 = vmul.f32 %v92_v5, %v724_v43 }
  0xc4   :  { %v531_v9 = vpop.eup %530  ;;  %v141_v10 = vadd.f32 %v133_v48, %v99_v58 }
  0xc5   :  { %v533_v12 = vpop.eup %532  ;;  %v370_v20 = vadd.f32 1.0, %v531_v9 }
  0xc6   :  { %v343_v60 = vpop.permute.xlu1 %342  ;;  %v535_v5 = vpop.eup %534  ;;  %v148_v22 = vmul.f32 0.5, %v141_v10  ;;  %v157_v30 = vadd.f32 1.0, %v533_v12 }
  0xc7   :  { %v351_v63 = vadd.f32 %v343_v60, %v309_v52  ;;  %v386_v1 = vpop.permute.xlu0 %385  ;;  %v537_v18 = vpop.eup %536  ;;  %v156_v29 = vadd.f32 1.0, %v535_v5  ;;  %v377_v42 = vmul.f32 0.5, %v370_v20 }
  0xc8   :  { %v409_v3 = vmul.f32 %v386_v1, %v374_v61  ;;  %v158_v46 = vadd.f32 1.0, %v537_v18  ;;  %v164_v53 = vmul.f32 0.5, %v157_v30 }
  0xc9   :  { %v358_v4 = vmul.f32 0.5, %v351_v63  ;;  %v163_v50 = vmul.f32 0.5, %v156_v29 }
  0xca   :  { %v428_v11 = vmul.f32 %v409_v3, %v374_v61  ;;  %v165_v1 = vmul.f32 0.5, %v158_v46 }
  0xcb   :  { %544 = vtanh.f32 %v358_v4  ;;  %v390_v13 = vpop.permute.xlu0 %389  ;;  %v382_v14 = vpop.permute.xlu1 %381 }
  0xcc   :  { %546 = vtanh.f32 %v147_v2  ;;  %v410_v15 = vmul.f32 %v390_v13, %v375_v54  ;;  %v408_v17 = vmul.f32 %v382_v14, %v373_v6  ;;  %v539_v21 = vpop.eup %538  ;;  %v435_v23 = vsub.f32 %v409_v3, %v428_v11 }
  0xcd   :  { %v541_v40 = vpop.eup %540  ;;  %v371_v44 = vadd.f32 1.0, %v539_v21  ;;  %548 = vtanh.f32 %v148_v22 }
  0xce   :  { %v429_v25 = vmul.f32 %v410_v15, %v375_v54  ;;  %v427_v26 = vmul.f32 %v408_v17, %v373_v6  ;;  %v415_v41 = vadd.f32 %v409_v3, %v408_v17  ;;  %v442_v47 = vmul.f32 %v435_v23, %v678_v34  ;;  %v543_v6 = vpop.eup %542 }
  0xcf   :  { %v394_v27 = vpop.permute.xlu0 %393  ;;  %v172_v28 = vpop.permute.xlu1 %171  ;;  %v159_v60 = vadd.f32 1.0, %v541_v40  ;;  %v378_v63 = vmul.f32 0.5, %v371_v44 }
  0xd0   :  { %v436_v35 = vsub.f32 %v410_v15, %v429_v25  ;;  %v434_v36 = vsub.f32 %v408_v17, %v427_v26  ;;  %v411_v38 = vmul.f32 %v394_v27, %v376_v19  ;;  %v416_v61 = vadd.f32 %v415_v41, %v410_v15 }
  0xd1   :  { %v198_v4 = vmul.f32 %v172_v28, %v163_v50  ;;  %v166_v54 = vmul.f32 0.5, %v159_v60 }
  0xd2   :  { %v441_v48 = vmul.f32 %v434_v36, %v672_v32  ;;  %v430_v49 = vmul.f32 %v411_v38, %v376_v19  ;;  %v443_v56 = vmul.f32 %v436_v35, %v687_v39  ;;  %v417_v39 = vadd.f32 %v416_v61, %v411_v38 }
  0xd3   :  { %v398_v51 = vpop.permute.xlu0 %397  ;;  %v176_v52 = vpop.permute.xlu1 %175  ;;  %v217_v17 = vmul.f32 %v198_v4, %v163_v50  ;;  %v160_v19 = vadd.f32 1.0, %v543_v6 }
  0xd4   :  { %v448_v57 = vadd.f32 %v442_v47, %v441_v48  ;;  %v412_v58 = vmul.f32 %v398_v51, %v377_v42  ;;  %v199_v62 = vmul.f32 %v176_v52, %v164_v53  ;;  %v437_v2 = vsub.f32 %v411_v38, %v430_v49 }
  0xd5   :  { %v224_v40 = vsub.f32 %v198_v4, %v217_v17 }
  0xd6   :  { %v449_v3 = vadd.f32 %v448_v57, %v443_v56  ;;  %v431_v34 = vmul.f32 %v412_v58, %v377_v42  ;;  %v218_v14 = vmul.f32 %v199_v62, %v164_v53  ;;  %v444_v15 = vmul.f32 %v437_v2, %v693_v55 }
  0xd7   :  { %v402_v32 = vpop.permute.xlu0 %401  ;;  %v180_v7 = vpop.permute.xlu1 %179  ;;  %v418_v20 = vadd.f32 %v417_v39, %v412_v58  ;;  %v167_v55 = vmul.f32 0.5, %v160_v19  ;;  %v205_v50 = vadd.f32 %v199_v62, %v198_v4 }
  0xd8   :  { %v545_v9 = vpop.eup %544  ;;  %v413_v10 = vmul.f32 %v402_v32, %v378_v63  ;;  %v200_v11 = vmul.f32 %v180_v7, %v165_v1  ;;  %v438_v13 = vsub.f32 %v412_v58, %v431_v34  ;;  %v225_v30 = vsub.f32 %v199_v62, %v218_v14 }
  0xd9   :  { %v547_v12 = vpop.eup %546  ;;  %v372_v5 = vadd.f32 1.0, %v545_v9  ;;  %v450_v38 = vadd.f32 %v449_v3, %v444_v15 }
  0xda   :  { %v432_v18 = vmul.f32 %v413_v10, %v378_v63  ;;  %v219_v21 = vmul.f32 %v200_v11, %v165_v1  ;;  %v161_v28 = vadd.f32 1.0, %v547_v12  ;;  %v445_v29 = vmul.f32 %v438_v13, %v703_v0  ;;  %v549_v42 = vpop.eup %548 }
  0xdb   :  { %v406_v22 = vpop.permute.xlu0 %405  ;;  %v379_v23 = vmul.f32 0.5, %v372_v5  ;;  %v184_v25 = vpop.permute.xlu1 %183  ;;  %v419_v35 = vadd.f32 %v418_v20, %v413_v10  ;;  %v232_v0 = vmul.f32 %v225_v30, %v676_v33  ;;  %v206_v58 = vadd.f32 %v205_v50, %v200_v11 }
  0xdc   :  { %v439_v26 = vsub.f32 %v413_v10, %v432_v18  ;;  %v201_v27 = vmul.f32 %v184_v25, %v166_v54  ;;  %v226_v46 = vsub.f32 %v200_v11, %v219_v21  ;;  %v168_v52 = vmul.f32 0.5, %v161_v28 }
  0xdd   :  { %v414_v36 = vmul.f32 %v406_v22, %v379_v23  ;;  %v451_v53 = vadd.f32 %v450_v38, %v445_v29  ;;  %v162_v63 = vadd.f32 1.0, %v549_v42  ;;  %v231_v1 = vmul.f32 %v224_v40, %v670_v31 }
  0xde   :  { %v220_v41 = vmul.f32 %v201_v27, %v166_v54  ;;  %v446_v44 = vmul.f32 %v439_v26, %v713_v16  ;;  %v233_v16 = vmul.f32 %v226_v46, %v689_v45  ;;  %v207_v62 = vadd.f32 %v206_v58, %v201_v27 }
  0xdf   :  { %v420_v47 = vadd.f32 %v419_v35, %v414_v36  ;;  %v433_v48 = vmul.f32 %v414_v36, %v379_v23  ;;  %v188_v49 = vpop.permute.xlu1 %187  ;;  %v238_v32 = vadd.f32 %v232_v0, %v231_v1  ;;  %v169_v54 = vmul.f32 0.5, %v162_v63 }
  0xe0   :  { %v202_v51 = vmul.f32 %v188_v49, %v167_v55  ;;  %v227_v57 = vsub.f32 %v201_v27, %v220_v41  ;;  %v452_v2 = vadd.f32 %v451_v53, %v446_v44 }
  0xe1   :  { %v440_v56 = vsub.f32 %v414_v36, %v433_v48  ;;  %v421_v60 = vrot.slane %v420_v47, 4  ;;  %v239_v12 = vadd.f32 %v238_v32, %v233_v16  ;;  %v461_v36 = vstv %s460_s0 }
  0xe2   :  { %v221_v61 = vmul.f32 %v202_v51, %v167_v55  ;;  %v234_v33 = vmul.f32 %v227_v57, %v699_v59  ;;  %v208_v10 = vadd.f32 %v207_v62, %v202_v51 }
  0xe3   :  { %v447_v3 = vmul.f32 %v440_v56, %v721_v37  ;;  %v192_v34 = vpop.permute.xlu1 %191  ;;  %v422_v9 = vadd.f32 %v421_v60, %v420_v47 }
  0xe4   :  { %v228_v4 = vsub.f32 %v202_v51, %v221_v61  ;;  %v203_v6 = vmul.f32 %v192_v34, %v168_v52  ;;  %v240_v15 = vadd.f32 %v239_v12, %v234_v33 }
  0xe5   :  { %v453_v7 = vadd.f32 %v452_v2, %v447_v3  ;;  %v423_v17 = vrot.slane %v422_v9, 2 }
  0xe6   :  { %v222_v11 = vmul.f32 %v203_v6, %v168_v52  ;;  %v235_v45 = vmul.f32 %v228_v4, %v707_v8  ;;  %v209_v13 = vadd.f32 %v208_v10, %v203_v6 }
  0xe7   :  { %v454_v39 = vrot.slane %v453_v7, 4  ;;  %v196_v31 = vpop.permute.xlu1 %195  ;;  %v424_v26 = vadd.f32 %v423_v17, %v422_v9 }
  0xe8   :  { %v229_v37 = vsub.f32 %v203_v6, %v222_v11  ;;  %v204_v14 = vmul.f32 %v196_v31, %v169_v54  ;;  %v241_v21 = vadd.f32 %v240_v15, %v235_v45 }
  0xe9   :  { %v455_v5 = vadd.f32 %v454_v39, %v453_v7  ;;  %v425_v40 = vrot.slane %v424_v26, 1 }
  0xea   :  { %v236_v18 = vmul.f32 %v229_v37, %v718_v24  ;;  %v210_v19 = vadd.f32 %v209_v13, %v204_v14  ;;  %v223_v59 = vmul.f32 %v204_v14, %v169_v54 }
  0xeb   :  { %v456_v20 = vrot.slane %v455_v5, 2  ;;  %v426_v46 = vadd.f32 %v425_v40, %v424_v26 }
  0xec   :  { %v211_v22 = vrot.slane %v210_v19, 4  ;;  %v230_v23 = vsub.f32 %v204_v14, %v223_v59  ;;  %v242_v27 = vadd.f32 %v241_v21, %v236_v18 }
  0xed   :  { %v457_v25 = vadd.f32 %v456_v20, %v455_v5 }
  0xee   :  { %v212_v28 = vadd.f32 %v211_v22, %v210_v19  ;;  %v237_v8 = vmul.f32 %v230_v23, %v724_v43 }
  0xef   :  { %v458_v29 = vrot.slane %v457_v25, 1 }
  0xf0   :  { %v213_v30 = vrot.slane %v212_v28, 2  ;;  %v243_v35 = vadd.f32 %v242_v27, %v237_v8 }
  0xf1   :  { %v459_v38 = vadd.f32 %v458_v29, %v457_v25 }
  0xf2   :  { %v214_v24 = vadd.f32 %v213_v30, %v212_v28  ;;  %v244_v41 = vrot.slane %v243_v35, 4 }
  0xf3   :  { %v462_v55 = vmul.f32 %v461_v36, %v459_v38 }
  0xf4   :  { %v215_v42 = vrot.slane %v214_v24, 1  ;;  %v245_v44 = vadd.f32 %v244_v41, %v243_v35 }
  0xf6   :  { %v216_v47 = vadd.f32 %v215_v42, %v214_v24  ;;  %v246_v48 = vrot.slane %v245_v44, 2 }
  0xf8   :  { %v247_v49 = vadd.f32 %v246_v48, %v245_v44  ;;  %v464_v50 = vsel %vm463_vm0, %v216_v47, %v426_v46 }
  0xf9   :  { %vm466_vm1 = vcmp.ge.f32.partialorder %v464_v50, 0.0  ;;  %vm467_vm2 = vcmp.le.f32.partialorder %v464_v50, 1.0 }
  0xfa   :  { %v248_v51 = vrot.slane %v247_v49, 1  ;;  %vm468_vm3 = vmand %vm466_vm1, %vm467_vm2 }
  0xfc   :  { %v249_v43 = vadd.f32 %v248_v51, %v247_v49 }
  0xfe   :  { %v465_v52 = vsel %vm463_vm0, %v249_v43, %v462_v55 }
  0xff   :  { %v469_v53 = vsel %vm468_vm3, %v465_v52, 1e-08 }
 0x100   :  { %550 = vlog2.f32 %v469_v53 }
 0x10d   :  { %v551_v0 = vpop.eup %550 }
 0x10e   :  { %v471_v56 = vmul.f32 0.6931472, %v551_v0 }
 0x110   :  { %v473_v57 = vsel %vm472_vm4, %v471_v56, 0.0 }
 0x111   :  { %474 = vadd.xlane.f32.xlu0 %v473_v57 }
 0x19a   :  { %v475_v58 = vpop.xlane.xlu0 %474 }
 0x19b   :  { %v476_v60 = vrot.slane %v475_v58, 4 }
 0x19d   :  { %v477_v61 = vadd.f32 %v476_v60, %v475_v58 }
 0x19f   :  { %v478_v63 = vrot.slane %v477_v61, 2 }
 0x1a1   :  { %v479_v1 = vadd.f32 %v478_v63, %v477_v61 }
 0x1a3   :  { %v480_v2 = vrot.slane %v479_v1, 1 }
 0x1a5   :  { %v481_v16 = vadd.f32 %v480_v2, %v479_v1 }
 0x1a7   :  { %505 = vpush %v481_v16 }
 0x1d8   :  { %s506_s22 = spop %505 }
 0x1d9   :  { %s483_s23 = ssub.f32 0.0, %s506_s22 }
 0x1db   :  { %s486_s24 = smul.f32 0.00390625, %s483_s23 }
 0x1dd   :  { %488 = sst [smem:[#allocation5]] %s486_s24 }
 0x1de   :  { %496 = dma.smem_to_hbm %s580_s25, 16, %s751_s3, [#allocation3]  }
 0x1df   :  { %574 = dma.done.wait [#allocation3], 16  }
 0x1e0   :  { %575 = vsyncadd [#allocation3], 4294967280 }
 0x1e1   :  { %500 = sfence }
 0x1e2   :  { %501 = vsyncpa [#allocation3], 1 }
 0x1e3   :  { %502 = vsyncpa [#allocation4], 1 }

</bundles_post_ra>
